<compile_context>
chip_gen: v7x
topology: tpu7x:2x2x1
jax: 0.10.0
libtpu: 0.0.40
codegen_flags: <defaults>
</compile_context>

<pallas_src>
import functools

import jax
import jax.numpy as jnp
from jax.experimental import pallas as pl
from jax.experimental.pallas import tpu as pltpu


def _round_up(x, m):
    return ((x + m - 1) // m) * m


def _pick_tile(total, cap):
    """Largest multiple of 128 that divides `total` (itself a 128-multiple) and is <= cap."""
    best = 128
    d = 128
    while d <= min(total, cap):
        if total % d == 0:
            best = d
        d += 128
    return best


def _row_tiling(B, T, rows_cap=512):
    """Pick (tb, n_row, B_pad).

    Small batches: one row tile (block dims equal full array dims, so no
    sublane-alignment constraints).  Otherwise tb is a multiple of 8 (so both
    the (tb, tn) feature block and the (tb*T, thw) activation block are
    sublane-aligned), tb*T targets ~rows_cap MXU rows (keeps w1 streaming
    above v6e's HBM roofline) and there are >= 2 row tiles so v7x's second
    TensorCore gets work on the leading "parallel" axis.  B is padded up to
    tb * n_row instead of ever falling back to tb = B.
    """
    tb_cap = max(1, rows_cap // max(T, 1))
    if B < 16 or B <= tb_cap:
        return B, 1, B
    tb_aligned = max(8, (tb_cap // 8) * 8)
    n_row = pl.cdiv(B, tb_aligned)              # >= 2 here
    tb = _round_up(pl.cdiv(B, n_row), 8)        # minimize batch padding
    return tb, n_row, tb * n_row


def _vmem_limit_bytes(x_blk, w1_blk, b1_blk, feat_blk, acc_bytes):
    # Double-buffered inputs/outputs + resident accumulator, with 2x headroom
    # for compiler temporaries; clamped to ~3/4 of physical VMEM.
    need = 2 * (x_blk + w1_blk + b1_blk + feat_blk) + acc_bytes
    limit = 2 * need + (8 << 20)
    try:
        phys = int(pltpu.get_tpu_info().vmem_capacity_bytes)
    except Exception:
        phys = 64 << 20          # conservative (v7x) fallback
    return max(32 << 20, min(limit, phys * 3 // 4))


def _video_feature_kernel(x_ref, w1_ref, b1_ref, feat_ref, acc_ref, *, t, inv_t):
    # x_ref   : (tb*T, thw) bf16   -- dense 2-D MXU block, no in-kernel reshape
    # w1_ref  : (thw, tn)   bf16
    # b1_ref  : (1, tn)     f32
    # feat_ref: (tb, tn)    f32    -- resident across the reduction axes (c, k)
    # acc_ref : (tb*T, tn)  f32    -- VMEM scratch accumulator
    c = pl.program_id(2)
    k = pl.program_id(3)

    @pl.when((c == 0) & (k == 0))
    def _init():
        acc_ref[...] = jnp.zeros_like(acc_ref)

    # sum_c  x[:, c, t, hw_chunk] @ w1[c, hw_chunk, :]  accumulated in f32.
    acc_ref[...] += jnp.dot(x_ref[...], w1_ref[...],
                            preferred_element_type=jnp.float32)

    @pl.when((c == pl.num_programs(2) - 1) & (k == pl.num_programs(3) - 1))
    def _finalize():
        # f32 epilogue: bias + ReLU, then temporal mean over T.
        h = jnp.maximum(acc_ref[...] + b1_ref[...], 0.0)        # (tb*T, tn)
        rows, tn = h.shape
        feat = h.reshape(rows // t, t, tn).sum(axis=1) * inv_t  # (tb, tn)
        feat_ref[...] = feat.astype(feat_ref.dtype)


def video_model_forward(x_ncthw, params):
    """x_ncthw: [B, C, T, H, W] float32 -> (logits [B,num_class], features [B,hidden])."""
    B, C, T, H, W = x_ncthw.shape
    HW = H * W
    w1, b1, w2, b2 = params
    D, hidden = w1.shape
    assert D == C * HW, "w1 first dim must equal C*H*W"
    num_class = w2.shape[1]

    # Lane-aligned padded sizes and tiles.
    HW_pad = _round_up(HW, 128)
    Hd_pad = _round_up(hidden, 128)
    thw = _pick_tile(HW_pad, 1024)          # large/contiguous spatial DMAs
    tn = _pick_tile(Hd_pad, 512)            # hidden tile bounds VMEM on v7x
    tb, n_row, B_pad = _row_tiling(B, T)

    # --- Host-side prep (one fused XLA pass over x): pad + B<->C outer-axis
    # transpose (moves whole contiguous T*HW chunks) + bf16 downcast. ---
    x4 = x_ncthw.reshape(B, C, T, HW)
    pad_b, pad_hw = B_pad - B, HW_pad - HW
    if pad_b or pad_hw:
        x4 = jnp.pad(x4, ((0, pad_b), (0, 0), (0, 0), (0, pad_hw)))
    x_cbt = jnp.transpose(x4, (1, 0, 2, 3)).reshape(
        C, B_pad * T, HW_pad).astype(jnp.bfloat16)

    w1r = w1.reshape(C, HW, hidden)
    w1r = jnp.pad(w1r, ((0, 0), (0, pad_hw), (0, Hd_pad - hidden))).astype(jnp.bfloat16)
    b1p = jnp.pad(b1.reshape(1, hidden),
                  ((0, 0), (0, Hd_pad - hidden))).astype(jnp.float32)

    grid = (n_row, Hd_pad // tn, C, HW_pad // thw)
    kernel = functools.partial(_video_feature_kernel, t=T, inv_t=1.0 / float(T))

    # Cost estimate: x read once (bf16), w1 re-streamed once per row tile.
    flops = int(2 * B_pad * T * C * HW_pad * Hd_pad)
    bytes_accessed = int(x_cbt.size * 2
                         + n_row * (w1r.size * 2 + b1p.size * 4)
                         + B_pad * Hd_pad * 4)

    vmem_limit = _vmem_limit_bytes(
        x_blk=tb * T * thw * 2,
        w1_blk=thw * tn * 2,
        b1_blk=8 * tn * 4,
        feat_blk=max(tb, 8) * tn * 4,
        acc_bytes=tb * T * tn * 4,
    )

    feat_pad = pl.pallas_call(
        kernel,
        out_shape=jax.ShapeDtypeStruct((B_pad, Hd_pad), jnp.float32),
        grid_spec=pltpu.PrefetchScalarGridSpec(
            num_scalar_prefetch=0,
            grid=grid,
            in_specs=[
                # x: (channel squeezed, tb*T rows, thw) at (c, ib, k)
                pl.BlockSpec((None, tb * T, thw), lambda ib, jh, c, k: (c, ib, k)),
                # w1: (channel squeezed, thw, tn) at (c, k, jh)
                pl.BlockSpec((None, thw, tn), lambda ib, jh, c, k: (c, k, jh)),
                # b1: (1, tn) at (0, jh)
                pl.BlockSpec((1, tn), lambda ib, jh, c, k: (0, jh)),
            ],
            out_specs=pl.BlockSpec((tb, tn), lambda ib, jh, c, k: (ib, jh)),
            scratch_shapes=[pltpu.VMEM((tb * T, tn), jnp.float32)],
        ),
        compiler_params=pltpu.CompilerParams(
            dimension_semantics=("parallel", "parallel", "arbitrary", "arbitrary"),
            vmem_limit_bytes=int(vmem_limit),
        ),
        cost_estimate=pl.CostEstimate(
            flops=flops, transcendentals=0, bytes_accessed=bytes_accessed),
    )(x_cbt, w1r, b1p)

    # Slice off batch / lane padding; tiny classifier runs in plain XLA
    # (negligible FLOPs, keeps a (hidden, num_class) slab out of kernel VMEM).
    feat = feat_pad[:B, :hidden]
    logits = feat @ w2.astype(jnp.float32) + b2.reshape(1, num_class).astype(jnp.float32)
    return logits, feat


def init_params(key, in_dim, hidden, num_class):
    k1, k2 = jax.random.split(key)
    w1 = jax.random.normal(k1, (in_dim, hidden), jnp.float32) * (in_dim ** -0.5)
    b1 = jnp.zeros((1, hidden), jnp.float32)
    w2 = jax.random.normal(k2, (hidden, num_class), jnp.float32) * (hidden ** -0.5)
    b2 = jnp.zeros((1, num_class), jnp.float32)
    return (w1, b1, w2, b2)


# TODO(synk): `get_augmentation` returns torchvision transform pipelines
# (data-loading config, not tensor compute) — no Pallas equivalent; omitted.


if __name__ == "__main__":
    # Small shapes consistent with a video model: B=2, C=4, T=8, H=W=16
    B, C, T, H, W = 2, 4, 8, 16, 16
    hidden, num_class = 32, 10

    key = jax.random.PRNGKey(0)
    kx, kp = jax.random.split(key)
    x = jax.random.normal(kx, (B, C, T, H, W), jnp.float32)
    params = init_params(kp, C * H * W, hidden, num_class)

    logits, feat = jax.jit(video_model_forward)(x, params)
    jax.block_until_ready((logits, feat))

    assert logits.shape == (B, num_class)
    assert feat.shape == (B, hidden)

    # Pure-JAX f32 reference (kernel uses bf16 MXU inputs, f32 accumulation).
    w1, b1, w2, b2 = params
    x_flat = jnp.transpose(x, (0, 2, 1, 3, 4)).reshape(B, T, C * H * W)
    h_r = jnp.maximum(jnp.einsum('btd,dh->bth', x_flat, w1) + b1, 0.0)
    feat_r = jnp.mean(h_r, axis=1)
    logits_r = feat_r @ w2 + b2
    assert float(jnp.max(jnp.abs(feat - feat_r))) < 0.25
    assert float(jnp.max(jnp.abs(logits - logits_r))) < 0.25

    print("KERNEL_OK")
</pallas_src>

<mosaic_0001>
module attributes {stable_mosaic.version = 11 : i64} {
  func.func @_video_feature_kernel(%arg0: i32, %arg1: i32, %arg2: i32, %arg3: i32, %arg4: memref<1x16x256xbf16, #tpu.memory_space<vmem>>, %arg5: memref<1x256x128xbf16, #tpu.memory_space<vmem>>, %arg6: memref<1x128xf32, #tpu.memory_space<vmem>>, %arg7: memref<2x128xf32, #tpu.memory_space<vmem>>, %arg8: memref<16x128xf32, #tpu.memory_space<vmem>>) attributes {dimension_semantics = [#tpu.dimension_semantics<parallel>, #tpu.dimension_semantics<parallel>, #tpu.dimension_semantics<arbitrary>, #tpu.dimension_semantics<arbitrary>], iteration_bounds = array<i64: 1, 1, 4, 1>, scalar_prefetch = 0 : i64, scratch_operands = 1 : i64, tpu.core_type = #tpu.core_type<tc>, window_params = [{transform_indices = @transform_0, window_bounds = array<i64: 1, 16, 256>}, {transform_indices = @transform_1, window_bounds = array<i64: 1, 256, 128>}, {transform_indices = @transform_2, window_bounds = array<i64: 1, 128>}, {transform_indices = @transform_3, window_bounds = array<i64: 2, 128>}]} {
    %c0_i32 = arith.constant 0 : i32
    %0 = arith.cmpi eq, %arg2, %c0_i32 : i32
    %c0_i32_0 = arith.constant 0 : i32
    %1 = arith.cmpi eq, %arg3, %c0_i32_0 : i32
    %2 = arith.andi %0, %1 : i1
    %3 = arith.extui %2 : i1 to i32
    %c0_i32_1 = arith.constant 0 : i32
    %4 = arith.cmpi ne, %3, %c0_i32_1 : i32
    scf.if %4 {
      %cst_13 = arith.constant 0.000000e+00 : f32
      %18 = vector.broadcast %cst_13 : f32 to vector<16x128xf32>
      %c0_14 = arith.constant 0 : index
      %c0_15 = arith.constant 0 : index
      %19 = vector.load %arg8[%c0_14, %c0_15] : memref<16x128xf32, #tpu.memory_space<vmem>>, vector<16x128xf32>
      tpu.vector_store %arg8[%c0_14, %c0_15], %18 {strides = array<i32>} : memref<16x128xf32, #tpu.memory_space<vmem>>, vector<16x128xf32>,
    } else {
    }
    %c0 = arith.constant 0 : index
    %c0_2 = arith.constant 0 : index
    %5 = vector.load %arg8[%c0, %c0_2] : memref<16x128xf32, #tpu.memory_space<vmem>>, vector<16x128xf32>
    %c0_3 = arith.constant 0 : index
    %c0_4 = arith.constant 0 : index
    %c0_5 = arith.constant 0 : index
    %6 = vector.load %arg4[%c0_3, %c0_4, %c0_5] : memref<1x16x256xbf16, #tpu.memory_space<vmem>>, vector<1x16x256xbf16>
    %7 = vector.shape_cast %6 : vector<1x16x256xbf16> to vector<16x256xbf16>
    %c0_6 = arith.constant 0 : index
    %c0_7 = arith.constant 0 : index
    %c0_8 = arith.constant 0 : index
    %8 = vector.load %arg5[%c0_6, %c0_7, %c0_8] : memref<1x256x128xbf16, #tpu.memory_space<vmem>>, vector<1x256x128xbf16>
    %9 = vector.shape_cast %8 : vector<1x256x128xbf16> to vector<256x128xbf16>
    %cst = arith.constant dense<0.000000e+00> : vector<16x128xf32>
    %10 = tpu.matmul %7, %9, %cst {dimension_numbers = #tpu.dot_dimension_numbers<[1], [0], [0], [1], [0, 0, 1, 1], [], []>} : vector<16x256xbf16>, vector<256x128xbf16>, vector<16x128xf32> -> vector<16x128xf32>
    %11 = arith.addf %5, %10 : vector<16x128xf32>
    %c0_9 = arith.constant 0 : index
    %c0_10 = arith.constant 0 : index
    %12 = vector.load %arg8[%c0_9, %c0_10] : memref<16x128xf32, #tpu.memory_space<vmem>>, vector<16x128xf32>
    tpu.vector_store %arg8[%c0_9, %c0_10], %11 {strides = array<i32>} : memref<16x128xf32, #tpu.memory_space<vmem>>, vector<16x128xf32>,
    %c3_i32 = arith.constant 3 : i32
    %13 = arith.cmpi eq, %arg2, %c3_i32 : i32
    %c0_i32_11 = arith.constant 0 : i32
    %14 = arith.cmpi eq, %arg3, %c0_i32_11 : i32
    %15 = arith.andi %13, %14 : i1
    %16 = arith.extui %15 : i1 to i32
    %c0_i32_12 = arith.constant 0 : i32
    %17 = arith.cmpi ne, %16, %c0_i32_12 : i32
    scf.if %17 {
      %c0_13 = arith.constant 0 : index
      %c0_14 = arith.constant 0 : index
      %18 = vector.load %arg8[%c0_13, %c0_14] : memref<16x128xf32, #tpu.memory_space<vmem>>, vector<16x128xf32>
      %c0_15 = arith.constant 0 : index
      %c0_16 = arith.constant 0 : index
      %19 = vector.load %arg6[%c0_15, %c0_16] : memref<1x128xf32, #tpu.memory_space<vmem>>, vector<1x128xf32>
      %20 = vector.broadcast %19 : vector<1x128xf32> to vector<16x128xf32>
      %21 = arith.addf %18, %20 : vector<16x128xf32>
      %cst_17 = arith.constant 0.000000e+00 : f32
      %22 = vector.broadcast %cst_17 : f32 to vector<16x128xf32>
      %23 = arith.maximumf %21, %22 : vector<16x128xf32>
      %24 = vector.shape_cast %23 : vector<16x128xf32> to vector<2x8x128xf32>
      %cst_18 = arith.constant dense<0.000000e+00> : vector<2x128xf32>
      %25 = vector.multi_reduction <add>, %24, %cst_18 [1] : vector<2x8x128xf32> to vector<2x128xf32>
      %cst_19 = arith.constant 1.250000e-01 : f32
      %26 = vector.broadcast %cst_19 : f32 to vector<2x128xf32>
      %27 = arith.mulf %25, %26 : vector<2x128xf32>
      %c0_20 = arith.constant 0 : index
      %c0_21 = arith.constant 0 : index
      %28 = vector.load %arg7[%c0_20, %c0_21] : memref<2x128xf32, #tpu.memory_space<vmem>>, vector<2x128xf32>
      tpu.vector_store %arg7[%c0_20, %c0_21], %27 {strides = array<i32>} : memref<2x128xf32, #tpu.memory_space<vmem>>, vector<2x128xf32>,
    } else {
    }
    return
  }
  func.func @transform_0(%arg0: i32, %arg1: i32, %arg2: i32, %arg3: i32) -> (i32, i32, i32) {
    %c0_i32 = arith.constant 0 : i32
    return %arg2, %arg0, %arg3 : i32, i32, i32
  }
  func.func @transform_1(%arg0: i32, %arg1: i32, %arg2: i32, %arg3: i32) -> (i32, i32, i32) {
    %c0_i32 = arith.constant 0 : i32
    return %arg2, %arg3, %arg1 : i32, i32, i32
  }
  func.func @transform_2(%arg0: i32, %arg1: i32, %arg2: i32, %arg3: i32) -> (i32, i32) {
    %c0_i32 = arith.constant 0 : i32
    %c0_i32_0 = arith.constant 0 : i32
    return %c0_i32, %arg1 : i32, i32
  }
  func.func @transform_3(%arg0: i32, %arg1: i32, %arg2: i32, %arg3: i32) -> (i32, i32) {
    %c0_i32 = arith.constant 0 : i32
    return %arg0, %arg1 : i32, i32
  }
}

</mosaic_0001>

<bundles_post_ra>
// kernel: video_model_forward.1
= control target key start
LH: loop header
LB: loop body
LE: loop exit
PB: predicated region body
PF: predicated region fallthrough
CT: control target
= control target key end

     0   :  { %s801_s12 = smov 0   ;;  %s803_s13 = smov 0   ;;  %s868_s0 = inlined_call_operand.vmem [shape: bf16[4,16,256], index: 0, kind: input, shape index: {}]   ;;  %s869_s1 = inlined_call_operand.vmem [shape: bf16[4,256,128], index: 1, kind: input, shape index: {}]   ;;  %s870_s2 = inlined_call_operand.vmem [shape: f32[1,128], index: 2, kind: input, shape index: {}]   ;;  %s871_s3 = inlined_call_operand.vmem [shape: f32[2,128], index: 3, kind: output, shape index: {}]  }
   0x1   :  { %s805_s14 = smov 0  }
   0x2 LB: > { %s31_s15 = sadd.s32 1, %s774_s13  ;;  %p657_p0 = scmp.ge.s32.totalorder %s778_s14, 1  ;;  %s778_s14 = sphi %s805_s14, %s13_s14   ;;  %s774_s13 = sphi %s803_s13, %s873_s13   ;;  %s770_s12 = sphi %s801_s12, %s872_s12  }
   0x3   : > { %p33_p1 = scmp.ge.s32.totalorder %s31_s15, 4  ;;  %p210_p2 = scmp.lt.s32.totalorder %s778_s14, 5 }
   0x5   : > { %s875_s15 = smov (%p33_p1, %s31_s15), 0  ;;  %p211_p3 = pnand %p657_p0, %p210_p2 }
   0x6   : > { %p262_p4 = scmp.lt.s32.totalorder (!%p211_p3), %s770_s12, 3  ;;  %p300_p5 = scmp.eq.s32.totalorder (!%p211_p3), %s770_s12, 0 }
   0x7   : > { %214 = sbr.rel (%p211_p3) target bundleno = 302 (0x12e), region = 32 }
   0xe   : > { %s263_s16 = scalar_select %p262_p4, %s770_s12, 3 }
   0xf   : > { %305 = sbr.rel (!%p300_p5) target bundleno = 22 (0x16), region = 36  ;;  %v780_v0 = vmov (%p300_p5), 0.0  }
  0x10   : > { %s686_s17 = sshll.u32 %s263_s16, 4  ;;  %s687_s18 = sshll.u32 %s263_s16, 7  ;;  %306 = vst [vmem:[#allocation2] sm:$0xff] (%p300_p5), %v780_v0  ;;  %307 = vst [vmem:[#allocation2 + $0x8] sm:$0xff] (%p300_p5), %v780_v0 }
  0x11   : > { %s827_s21 = scalar_lea.vmem %s868_s0, %s686_s17  ;;  %s832_s24 = scalar_lea.vmem %s869_s1, %s687_s18 }
  0x16 PF: > { %v737_v1 = vld [vmem:[%s832_s24 + $0x40] sm:$0xff]   ;;  %v739_v3 = vld [vmem:[%s832_s24 + $0x48] sm:$0xff]   ;;  %v741_v5 = vld [vmem:[%s832_s24 + $0x50] sm:$0xff]   ;;  %p495_p6 = scmp.eq.s32.totalorder %s770_s12, 3 }
  0x17   : > { %v738_v2 = vld [vmem:[%s832_s24] sm:$0xff]   ;;  %690 = vmatprep.subr.bf16.mxu0 %v737_v1  ;;  %v740_v4 = vld [vmem:[%s832_s24 + $0x8] sm:$0xff]   ;;  %v742_v6 = vld [vmem:[%s832_s24 + $0x10] sm:$0xff]   ;;  %vm529_vm0 = vcmask (%p495_p6), 1041409  }
  0x18   : > { %691 = vmatpush3.bf16.msra.mxu0 %v738_v2  ;;  %v743_v7 = vld [vmem:[%s832_s24 + $0x58] sm:$0xff]   ;;  %v745_v9 = vld [vmem:[%s832_s24 + $0x60] sm:$0xff]   ;;  %v747_v11 = vld [vmem:[%s832_s24 + $0x68] sm:$0xff]  }
  0x19   : > { %692 = vmatprep.subr.bf16.mxu0 %v739_v3  ;;  %v744_v8 = vld [vmem:[%s832_s24 + $0x18] sm:$0xff]   ;;  %v746_v10 = vld [vmem:[%s832_s24 + $0x20] sm:$0xff]   ;;  %v748_v13 = vld [vmem:[%s832_s24 + $0x28] sm:$0xff]  }
  0x1a   : > { %v755_v12 = vld [vmem:[%s827_s21 + $0x4] ss:$8 sps:$4 sm:$0xff]   ;;  %v749_v14 = vld [vmem:[%s832_s24 + $0x70] sm:$0xff]   ;;  %v751_v16 = vld [vmem:[%s832_s24 + $0x78] sm:$0xff]  }
  0x1b   : > { %482 = vmatprep.mubr.bf16.mxu0 %v755_v12  ;;  %v750_v15 = vld [vmem:[%s832_s24 + $0x30] sm:$0xff]   ;;  %v752_v17 = vld [vmem:[%s832_s24 + $0x38] sm:$0xff]   ;;  %v753_v18 = vld [vmem:[%s827_s21] ss:$8 sps:$4 sm:$0xff]  }
  0x1c   : > { %693 = vmatpush3.bf16.msra.mxu0 %v740_v4  ;;  %v308_v20 = vld [vmem:[#allocation2] sm:$0xff]  ;;  %v309_v24 = vld [vmem:[#allocation2 + $0x8] sm:$0xff] }
  0x1d   : > { %694 = vmatprep.subr.bf16.mxu0 %v741_v5  ;;  %v682_v31 = vld [vmem:[%s870_s2] ss:$0 sm:$0xff] (%p495_p6) }
  0x20   : > { %695 = vmatpush3.bf16.msra.mxu0 %v742_v6 }
  0x21   : > { %696 = vmatprep.subr.bf16.mxu0 %v743_v7 }
  0x24   : > { %697 = vmatpush3.bf16.msra.mxu0 %v744_v8 }
  0x25   : > { %698 = vmatprep.subr.bf16.mxu0 %v745_v9 }
  0x28   : > { %699 = vmatpush3.bf16.msra.mxu0 %v746_v10 }
  0x29   : > { %700 = vmatprep.subr.bf16.mxu0 %v747_v11 }
  0x2c   : > { %701 = vmatpush3.bf16.msra.mxu0 %v748_v13 }
  0x2d   : > { %702 = vmatprep.subr.bf16.mxu0 %v749_v14 }
  0x30   : > { %703 = vmatpush3.bf16.msra.mxu0 %v750_v15 }
  0x31   : > { %704 = vmatprep.subr.bf16.mxu0 %v751_v16 }
  0x34   : > { %705 = vmatpush3.bf16.msra.mxu0 %v752_v17 }
  0x37   : > { %483 = vmatmul.mubr.bf16.vlgmr.msra.gmra.mrb[0].mxu0 %v753_v18 }
 0x10a   : > { %v706_v19 = vpop.f32.mrb[0].mxu0 }
 0x10b   : > { %v707_v21 = vpop.f32.mrb[1].mxu0 }
 0x10c   : > { %v708_v22 = vadd.f32 %v707_v21, %v706_v19  ;;  %v709_v23 = vpop.f32.mrb[2].mxu0  ;;  %499 = sbr.rel (!%p495_p6) target bundleno = 302 (0x12e), region = 40 }
 0x10d   : > { %v710_v25 = vpop.f32.mrb[3].mxu0 }
 0x10e   : > { %v491_v26 = vadd.f32 %v708_v22, %v308_v20  ;;  %v711_v27 = vadd.f32 %v710_v25, %v709_v23 }
 0x110   : > { %493 = vst [vmem:[#allocation2] sm:$0xff] %v491_v26  ;;  %v492_v28 = vadd.f32 %v711_v27, %v309_v24 }
 0x112   : > { %494 = vst [vmem:[#allocation2 + $0x8] sm:$0xff] %v492_v28 }
 0x117   : > { %v500_v29 = vld [vmem:[#allocation2] sm:$0xff] }
 0x118   : > { %v509_v32 = vadd.f32 %v682_v31, %v500_v29 }
 0x119   : > { %v501_v30 = vld [vmem:[#allocation2 + $0x8] sm:$0xff] }
 0x11a   : > { %v510_v33 = vadd.f32 %v682_v31, %v501_v30  ;;  %v511_v34 = vmax.f32 %v509_v32, 0.0 }
 0x11c   : > { %v512_v35 = vmax.f32 %v510_v33, 0.0  ;;  %v513_v36 = vrot.slane %v511_v34, 4 }
 0x11e   : > { %v519_v37 = vrot.slane %v512_v35, 4  ;;  %v514_v38 = vadd.f32 %v513_v36, %v511_v34 }
 0x120   : > { %v520_v39 = vadd.f32 %v519_v37, %v512_v35  ;;  %v515_v40 = vrot.slane %v514_v38, 2 }
 0x122   : > { %v521_v41 = vrot.slane %v520_v39, 2  ;;  %v516_v42 = vadd.f32 %v515_v40, %v514_v38 }
 0x124   : > { %v522_v43 = vadd.f32 %v521_v41, %v520_v39  ;;  %v517_v44 = vrot.slane %v516_v42, 1 }
 0x126   : > { %v523_v45 = vrot.slane %v522_v43, 1  ;;  %v518_v46 = vadd.f32 %v517_v44, %v516_v42 }
 0x128   : > { %v524_v47 = vadd.f32 %v523_v45, %v522_v43  ;;  %v525_v48 = vmul.f32 0.125, %v518_v46 }
 0x12a   : > { %v526_v49 = vmul.f32 0.125, %v524_v47 }
 0x12c   : > { %v530_v50 = vsel %vm529_vm0, %v526_v49, %v525_v48 }
 0x12d   : > { %532 = vst [vmem:[%s871_s3] sm:$0x3] %v530_v50 }
 0x12e PF: > { %s13_s14 = sadd.s32 1, %s778_s14   ;;  %s872_s12 = smov %s774_s13 }
 0x12f   : > { %p10_p7 = scmp.ge.s32.totalorder %s13_s14, 6   ;;  %s873_s13 = smov %s875_s15 }
 0x131   :  { %12 = sbr.rel (!%p10_p7) target bundleno = 2 (0x2), region = 76 }

</bundles_post_ra>
